<compile_context>
chip_gen: v7x
topology: tpu7x:2x2x1
jax: 0.10.0
libtpu: 0.0.40
codegen_flags: <defaults>
</compile_context>

<pallas_src>
import functools

import jax
import jax.numpy as jnp
from jax import lax
from jax.experimental import pallas as pl
from jax.experimental.pallas import tpu as pltpu


def _laplacian_kernel(masks_ref, x_ref, o_ref, *, H, W):
    HW = H * W
    x = x_ref[...]                     # (block_rows, H*W)
    m = masks_ref[...]                 # (4, H*W) resident boundary masks

    # roll(x, s, 1)[k] = x[(k - s) mod HW]; masks zero the wrap-around taps,
    # emulating conv2d's zero padding=1.
    up    = pltpu.roll(x, W, 1)      * m[0:1, :]   # x[i-1, j]
    down  = pltpu.roll(x, HW - W, 1) * m[1:2, :]   # x[i+1, j]
    left  = pltpu.roll(x, 1, 1)      * m[2:3, :]   # x[i, j-1]
    right = pltpu.roll(x, HW - 1, 1) * m[3:4, :]   # x[i, j+1]

    out = (up + down) + (left + right) - 4.0 * x
    o_ref[...] = out.astype(o_ref.dtype)


def laplacian_forward(x, block_rows=None):
    """x: (N, 2, H, W). Per-channel 3x3 Laplacian with zero padding=1."""
    N, C, H, W = x.shape
    B = N * C
    HW = H * W
    itemsize = x.dtype.itemsize

    xf = x.reshape(B, HW)

    # Precomputed boundary masks (tiny: 4 * H*W elements), fed once and kept
    # resident in VMEM via a constant index_map.
    col = jnp.arange(HW, dtype=jnp.int32)
    j = col % W
    masks = jnp.stack(
        [col >= W,                 # up tap valid
         col < (H - 1) * W,        # down tap valid
         j > 0,                    # left tap valid
         j < W - 1],               # right tap valid
        axis=0).astype(x.dtype)    # (4, HW)

    if block_rows is None:
        if B < 16:
            # Single full-array block: exempt from the (8,128) rule, no pad,
            # no output slice. (Grid splitting only pays off for bigger work.)
            block_rows = B
        else:
            # ~1 MiB payload per block; with double-buffered in/out and the
            # ~6x intermediate blow-up this stays well under every chip's
            # VMEM (v5e 16 MiB default scoped, v7x 64 MiB physical).
            rows_budget = max(8, ((1 << 20) // (HW * itemsize)) // 8 * 8)
            # Keep >= 4 grid steps (>= 2 minimum) so the pipeline overlaps
            # DMA-in/writeback with compute and v7x megacore can shard the
            # "parallel" axis across both TensorCores.
            rows_for_4_blocks = max(8, (B // 4) // 8 * 8)
            block_rows = min(rows_budget, rows_for_4_blocks)
            if B % 8 == 0:
                # Make block_rows divide B -> every block is a full tile
                # (unmasked vector stores, no OOB tail block).
                while B % block_rows:
                    block_rows -= 8
    num_blocks = pl.cdiv(B, block_rows)

    block_bytes = block_rows * HW * itemsize
    mask_bytes = 4 * HW * itemsize
    # Footprint: 2x double-buffered input + 2x output + ~6x intermediates
    # (four rolled copies, products, accumulation) + masks + slack.
    vmem_limit = int(min(max(12 * block_bytes + 2 * mask_bytes + (4 << 20),
                             32 << 20),
                         48 << 20))

    kernel = functools.partial(_laplacian_kernel, H=H, W=W)
    cost = pl.CostEstimate(
        flops=10 * B * HW,                                # 4 mul + 4 add + mul + sub
        transcendentals=0,
        bytes_accessed=(2 * B * HW + 4 * HW) * itemsize,
    )

    out = pl.pallas_call(
        kernel,
        out_shape=jax.ShapeDtypeStruct((B, HW), x.dtype),
        grid=(num_blocks,),
        in_specs=[
            pl.BlockSpec((4, HW), lambda i: (0, 0)),            # masks (resident)
            pl.BlockSpec((block_rows, HW), lambda i: (i, 0)),   # input rows
        ],
        out_specs=pl.BlockSpec((block_rows, HW), lambda i: (i, 0)),
        compiler_params=pltpu.CompilerParams(
            dimension_semantics=("parallel",),
            vmem_limit_bytes=vmem_limit),
        cost_estimate=cost,
    )(masks, xf)
    return out.reshape(N, C, H, W)


def _reference(x, weight):
    # Pure-JAX reference: per-channel 3x3 conv with zero padding (depthwise).
    N, C, H, W = x.shape
    xf = x.reshape(N * C, 1, H, W)
    wf = weight.reshape(1, 1, 3, 3)
    y = lax.conv_general_dilated(
        xf, wf, window_strides=(1, 1), padding=((1, 1), (1, 1)),
        dimension_numbers=("NCHW", "OIHW", "NCHW"))
    return y.reshape(N, C, H, W)


if __name__ == "__main__":
    # Fixed (non-trainable) Laplacian weight from the PyTorch module.
    weight = jnp.array([[0.0, 1.0, 0.0],
                        [1.0, -4.0, 1.0],
                        [0.0, 1.0, 0.0]], dtype=jnp.float32)

    key = jax.random.PRNGKey(0)
    x = jax.random.normal(key, (2, 2, 16, 16), dtype=jnp.float32)  # (N, 2, H, W)

    out = laplacian_forward(x)
    out = jax.block_until_ready(out)

    ref = _reference(x, weight)
    assert out.shape == x.shape and out.dtype == x.dtype
    assert jnp.allclose(out, ref, atol=1e-5, rtol=1e-5)

    print("KERNEL_OK")
</pallas_src>

<mosaic_0001>
module attributes {stable_mosaic.version = 11 : i64} {
  func.func @_laplacian_kernel(%arg0: i32, %arg1: memref<4x256xf32, #tpu.memory_space<vmem>>, %arg2: memref<4x256xf32, #tpu.memory_space<vmem>>, %arg3: memref<4x256xf32, #tpu.memory_space<vmem>>) attributes {dimension_semantics = [#tpu.dimension_semantics<parallel>], iteration_bounds = array<i64: 1>, scalar_prefetch = 0 : i64, scratch_operands = 0 : i64, tpu.core_type = #tpu.core_type<tc>, window_params = [{pipeline_mode = #tpu.pipeline_mode<synchronous>, transform_indices = @transform_0, window_bounds = array<i64: 4, 256>}, {transform_indices = @transform_1, window_bounds = array<i64: 4, 256>}, {transform_indices = @transform_2, window_bounds = array<i64: 4, 256>}]} {
    %c0 = arith.constant 0 : index
    %c0_0 = arith.constant 0 : index
    %0 = vector.load %arg2[%c0, %c0_0] : memref<4x256xf32, #tpu.memory_space<vmem>>, vector<4x256xf32>
    %c0_1 = arith.constant 0 : index
    %c0_2 = arith.constant 0 : index
    %1 = vector.load %arg1[%c0_1, %c0_2] : memref<4x256xf32, #tpu.memory_space<vmem>>, vector<4x256xf32>
    %c16_i32 = arith.constant 16 : i32
    %2 = tpu.dynamic_rotate %0 by %c16_i32 dim 1 : vector<4x256xf32>, i32 -> vector<4x256xf32>
    %3 = vector.extract_strided_slice %1 {offsets = [0, 0], sizes = [1, 256], strides = [1, 1]} : vector<4x256xf32> to vector<1x256xf32>
    %4 = vector.broadcast %3 : vector<1x256xf32> to vector<4x256xf32>
    %5 = arith.mulf %2, %4 : vector<4x256xf32>
    %c240_i32 = arith.constant 240 : i32
    %6 = tpu.dynamic_rotate %0 by %c240_i32 dim 1 : vector<4x256xf32>, i32 -> vector<4x256xf32>
    %7 = vector.extract_strided_slice %1 {offsets = [1, 0], sizes = [1, 256], strides = [1, 1]} : vector<4x256xf32> to vector<1x256xf32>
    %8 = vector.broadcast %7 : vector<1x256xf32> to vector<4x256xf32>
    %9 = arith.mulf %6, %8 : vector<4x256xf32>
    %c1_i32 = arith.constant 1 : i32
    %10 = tpu.dynamic_rotate %0 by %c1_i32 dim 1 : vector<4x256xf32>, i32 -> vector<4x256xf32>
    %11 = vector.extract_strided_slice %1 {offsets = [2, 0], sizes = [1, 256], strides = [1, 1]} : vector<4x256xf32> to vector<1x256xf32>
    %12 = vector.broadcast %11 : vector<1x256xf32> to vector<4x256xf32>
    %13 = arith.mulf %10, %12 : vector<4x256xf32>
    %c255_i32 = arith.constant 255 : i32
    %14 = tpu.dynamic_rotate %0 by %c255_i32 dim 1 : vector<4x256xf32>, i32 -> vector<4x256xf32>
    %15 = vector.extract_strided_slice %1 {offsets = [3, 0], sizes = [1, 256], strides = [1, 1]} : vector<4x256xf32> to vector<1x256xf32>
    %16 = vector.broadcast %15 : vector<1x256xf32> to vector<4x256xf32>
    %17 = arith.mulf %14, %16 : vector<4x256xf32>
    %18 = arith.addf %5, %9 : vector<4x256xf32>
    %19 = arith.addf %13, %17 : vector<4x256xf32>
    %20 = arith.addf %18, %19 : vector<4x256xf32>
    %cst = arith.constant 4.000000e+00 : f32
    %21 = vector.broadcast %cst : f32 to vector<4x256xf32>
    %22 = arith.mulf %21, %0 : vector<4x256xf32>
    %23 = arith.subf %20, %22 : vector<4x256xf32>
    %c0_3 = arith.constant 0 : index
    %c0_4 = arith.constant 0 : index
    %24 = vector.load %arg3[%c0_3, %c0_4] : memref<4x256xf32, #tpu.memory_space<vmem>>, vector<4x256xf32>
    tpu.vector_store %arg3[%c0_3, %c0_4], %23 {strides = array<i32>} : memref<4x256xf32, #tpu.memory_space<vmem>>, vector<4x256xf32>,
    return
  }
  func.func @transform_0(%arg0: i32) -> (i32, i32) {
    %c0_i32 = arith.constant 0 : i32
    %c0_i32_0 = arith.constant 0 : i32
    %c0_i32_1 = arith.constant 0 : i32
    return %c0_i32, %c0_i32_0 : i32, i32
  }
  func.func @transform_1(%arg0: i32) -> (i32, i32) {
    %c0_i32 = arith.constant 0 : i32
    %c0_i32_0 = arith.constant 0 : i32
    return %arg0, %c0_i32 : i32, i32
  }
  func.func @transform_2(%arg0: i32) -> (i32, i32) {
    %c0_i32 = arith.constant 0 : i32
    %c0_i32_0 = arith.constant 0 : i32
    return %arg0, %c0_i32 : i32, i32
  }
}

</mosaic_0001>

<bundles_post_ra>
// kernel: tpu_custom_call.1
= control target key start
LH: loop header
LB: loop body
LE: loop exit
PB: predicated region body
PF: predicated region fallthrough
CT: control target
= control target key end

     0   :  { %7 = vsyncpa [#allocation3], 0  ;;  %s327_s0 = inlined_call_operand.hbm [shape: f32[4,256], index: 0, kind: input, shape index: {}]   ;;  %s328_s1 = inlined_call_operand.hbm [shape: f32[4,256], index: 1, kind: input, shape index: {}]   ;;  %s329_s2 = inlined_call_operand.hbm [shape: f32[4,256], index: 2, kind: output, shape index: {}]  }
   0x1   :  { %8 = vsyncpa [#allocation6], 0 }
   0x2   :  { %9 = vsyncpa [#allocation4], 0  ;;  %s265_s9 = smov [#allocation2]   ;;  %s266_s11 = smov [#allocation5]  }
   0x3   :  { %s16_s10 = sshll.u32 %s265_s9, 4  ;;  %s26_s12 = sshll.u32 %s266_s11, 4  ;;  %s17_s10 = int_to_ptr.vmem [resolvable:$true] %s16_s10  ;;  %s27_s12 = int_to_ptr.vmem [resolvable:$true] %s26_s12 }
   0x4   :  { %s193_s15 = scalar_lea.hbm %s327_s0, 128 }
   0x5   :  { %p194_p0 = scmp.ne.s32.totalorder %s327_s0, %s193_s15  ;;  %p197_p1 = scmp.lt.u32.totalorder %s193_s15, %s327_s0 }
   0x7   :  { %p199_p2 = pnand %p197_p1, %p194_p0 }
   0x9   :  { %202 = shalt.err (!%p199_p2)
}
   0xa   :  { %s203_s20 = scalar_lea.vmem %s17_s10, 128  ;;  %p208_p4 = scmp.lt.s32.totalorder %s17_s10, %s17_s10 }
   0xb   :  { %p204_p3 = scmp.ne.s32.totalorder %s17_s10, %s203_s20  ;;  %p209_p5 = scmp.lt.s32.totalorder %s203_s20, %s203_s20 }
   0xd   :  { %p210_p6 = por %p209_p5, %p208_p4 }
   0xf   :  { %p211_p7 = pnand %p210_p6, %p204_p3 }
  0x11   :  { %214 = shalt.err (!%p211_p7)
}
  0x12   :  { %19 = dma.hbm_to_vmem [thread:$0]  %s327_s0, 128, %s17_s10, [#allocation3]  }
  0x13   :  { %s215_s25 = scalar_lea.hbm %s328_s1, 128 }
  0x14   :  { %p216_p8 = scmp.ne.s32.totalorder %s328_s1, %s215_s25  ;;  %p219_p9 = scmp.lt.u32.totalorder %s215_s25, %s328_s1 }
  0x16   :  { %p221_p10 = pnand %p219_p9, %p216_p8 }
  0x18   :  { %224 = shalt.err (!%p221_p10)
}
  0x19   :  { %s225_s30 = scalar_lea.vmem %s27_s12, 128  ;;  %p230_p12 = scmp.lt.s32.totalorder %s27_s12, %s27_s12 }
  0x1a   :  { %p226_p11 = scmp.ne.s32.totalorder %s27_s12, %s225_s30  ;;  %p231_p13 = scmp.lt.s32.totalorder %s225_s30, %s225_s30 }
  0x1c   :  { %p232_p0 = por %p231_p13, %p230_p12 }
  0x1e   :  { %p233_p1 = pnand %p232_p0, %p226_p11 }
  0x20   :  { %236 = shalt.err (!%p233_p1)
}
  0x21   :  { %29 = dma.hbm_to_vmem [thread:$0]  %s328_s1, 128, %s27_s12, [#allocation6]  }
  0x22   :  { %259 = dma.done.wait [#allocation3], 128  }
  0x23   :  { %260 = vsyncadd [#allocation3], 4294967168 }
  0x24   :  { %261 = dma.done.wait [#allocation6], 128  }
  0x25   :  { %262 = vsyncadd [#allocation6], 4294967168  ;;  %v36_v0 = vld [vmem:[#allocation5] sm:$0xff]  ;;  %s267_s4 = smov 112   ;;  %s268_s5 = smov 16   ;;  %v45_v2 = vlaneseq  ;;  %v37_v10 = vld [vmem:[#allocation2] sm:$0xff] }
  0x26   :  { %71 = vrot.lane.b32.xlu1 %v36_v0, %s267_s4  ;;  %41 = vrot.lane.b32.xlu0 %v36_v0, %s268_s5  ;;  %v39_v1 = vcombine.high %v36_v0, %v36_v0  ;;  %s269_s6 = smov 1   ;;  %s270_s7 = smov 127   ;;  %v158_v42 = vmul.f32 4.0, %v36_v0 }
  0x27   :  { %v52_v3 = vshrl.u32 %v45_v2, 7  ;;  %v46_v15 = vand.u32 127, %v45_v2  ;;  %s271_s1 = smov [#allocation7]  }
  0x28   :  { %v160_v55 = vcombine.high %v158_v42, %v158_v42  ;;  %s175_s8 = sshll.u32 %s271_s1, 4  ;;  %s176_s8 = int_to_ptr.vmem [resolvable:$true] %s175_s8 }
  0x29   :  { %v80_v6 = vsub.s32 1, %v52_v3  ;;  %v84_v7 = vsub.s32 5, %v52_v3  ;;  %v53_v8 = vsub.s32 0, %v52_v3  ;;  %v57_v9 = vsub.s32 4, %v52_v3  ;;  %s237_s9 = scalar_lea.vmem %s176_s8, 128  ;;  %p242_p3 = scmp.lt.s32.totalorder %s176_s8, %s176_s8 }
  0x2a   :  { %98 = vrot.lane.b32.xlu0 %v36_v0, %s269_s6  ;;  %73 = vrot.lane.b32.xlu1 %v39_v1, %s267_s4  ;;  %v107_v11 = vsub.s32 2, %v52_v3  ;;  %v111_v12 = vsub.s32 6, %v52_v3  ;;  %v134_v13 = vsub.s32 3, %v52_v3  ;;  %v138_v14 = vsub.s32 7, %v52_v3  ;;  %p238_p2 = scmp.ne.s32.totalorder %s176_s8, %s237_s9  ;;  %p243_p4 = scmp.lt.s32.totalorder %s237_s9, %s237_s9 }
  0x2b   :  { %v81_v17 = vrot.slane %v37_v10, %v80_v6  ;;  %v85_v18 = vrot.slane %v37_v10, %v84_v7  ;;  %v54_v20 = vrot.slane %v37_v10, %v53_v8  ;;  %v58_v21 = vrot.slane %v37_v10, %v57_v9 }
  0x2c   :  { %v108_v22 = vrot.slane %v37_v10, %v107_v11  ;;  %v112_v23 = vrot.slane %v37_v10, %v111_v12  ;;  %vm47_vm0 = vcmp.lt.s32.totalorder %v46_v15, 16  ;;  %v135_v24 = vrot.slane %v37_v10, %v134_v13  ;;  %p244_p5 = por %p243_p4, %p242_p3 }
  0x2d   :  { %v139_v25 = vrot.slane %v37_v10, %v138_v14  ;;  %vm75_vm1 = vcmp.lt.s32.totalorder %v46_v15, 112  ;;  %vm102_vm2 = vcmp.lt.s32.totalorder %v46_v15, 1  ;;  %vm129_vm3 = vcmp.lt.s32.totalorder %v46_v15, 127 }
  0x2e   :  { %100 = vrot.lane.b32.xlu1 %v39_v1, %s269_s6  ;;  %43 = vrot.lane.b32.xlu0 %v39_v1, %s268_s5  ;;  %v91_v26 = vrot.slane %v81_v17, %v80_v6  ;;  %v95_v27 = vrot.slane %v85_v18, %v80_v6  ;;  %v64_v29 = vrot.slane %v54_v20, %v53_v8  ;;  %p245_p6 = pnand %p244_p5, %p238_p2 }
  0x2f   :  { %v68_v30 = vrot.slane %v58_v21, %v53_v8  ;;  %v118_v32 = vrot.slane %v108_v22, %v107_v11  ;;  %v122_v33 = vrot.slane %v112_v23, %v107_v11  ;;  %v145_v38 = vrot.slane %v135_v24, %v134_v13 }
  0x30   :  { %v149_v39 = vrot.slane %v139_v25, %v134_v13 }
  0x32   :  { %127 = vrot.lane.b32.xlu1 %v39_v1, %s270_s7  ;;  %125 = vrot.lane.b32.xlu0 %v36_v0, %s270_s7 }
  0x98   :  { %v72_v4 = vpop.permute.xlu1 %71  ;;  %v42_v5 = vpop.permute.xlu0 %41 }
  0x9c   :  { %v99_v16 = vpop.permute.xlu0 %98  ;;  %v74_v19 = vpop.permute.xlu1 %73 }
  0x9d   :  { %v76_v36 = vsel %vm75_vm1, %v72_v4, %v74_v19  ;;  %v77_v37 = vsel %vm75_vm1, %v74_v19, %v72_v4 }
  0x9e   :  { %v96_v47 = vmul.f32 %v91_v26, %v76_v36  ;;  %v97_v48 = vmul.f32 %v95_v27, %v77_v37 }
  0xa0   :  { %v101_v28 = vpop.permute.xlu1 %100  ;;  %v44_v31 = vpop.permute.xlu0 %43 }
  0xa1   :  { %v48_v34 = vsel %vm47_vm0, %v42_v5, %v44_v31  ;;  %v49_v35 = vsel %vm47_vm0, %v44_v31, %v42_v5  ;;  %v103_v40 = vsel %vm102_vm2, %v99_v16, %v101_v28  ;;  %v104_v41 = vsel %vm102_vm2, %v101_v28, %v99_v16 }
  0xa2   :  { %v69_v43 = vmul.f32 %v64_v29, %v49_v35  ;;  %v70_v44 = vmul.f32 %v68_v30, %v48_v34  ;;  %v123_v51 = vmul.f32 %v118_v32, %v104_v41  ;;  %v124_v52 = vmul.f32 %v122_v33, %v103_v40 }
  0xa4   :  { %v128_v45 = vpop.permute.xlu1 %127  ;;  %v126_v46 = vpop.permute.xlu0 %125  ;;  %v152_v56 = vadd.f32 %v96_v47, %v69_v43  ;;  %v153_v57 = vadd.f32 %v97_v48, %v70_v44 }
  0xa5   :  { %v130_v49 = vsel %vm129_vm3, %v126_v46, %v128_v45  ;;  %v131_v50 = vsel %vm129_vm3, %v128_v45, %v126_v46 }
  0xa6   :  { %v150_v53 = vmul.f32 %v145_v38, %v130_v49  ;;  %v151_v54 = vmul.f32 %v149_v39, %v131_v50 }
  0xa8   :  { %v154_v58 = vadd.f32 %v150_v53, %v123_v51  ;;  %v155_v59 = vadd.f32 %v151_v54, %v124_v52 }
  0xaa   :  { %v156_v60 = vadd.f32 %v154_v58, %v152_v56  ;;  %v157_v61 = vadd.f32 %v155_v59, %v153_v57 }
  0xac   :  { %v162_v62 = vsub.f32 %v156_v60, %v158_v42  ;;  %v163_v63 = vsub.f32 %v157_v61, %v160_v55 }
  0xae   :  { %v166_v0 = vcombine.low %v162_v62, %v163_v63 }
  0xb0   :  { %168 = vst [vmem:[#allocation7] sm:$0xff] %v166_v0 }
  0xb1   :  { %248 = shalt.err (!%p245_p6)
}
  0xb2   :  { %s249_s12 = scalar_lea.hbm %s329_s2, 128 }
  0xb3   :  { %p250_p7 = scmp.ne.s32.totalorder %s329_s2, %s249_s12  ;;  %p253_p8 = scmp.lt.u32.totalorder %s249_s12, %s329_s2 }
  0xb5   :  { %p255_p9 = pnand %p253_p8, %p250_p7 }
  0xb7   :  { %258 = shalt.err (!%p255_p9)
}
  0xb8   :  { %178 = dma.vmem_to_hbm [thread:$0]  %s176_s8, 128, %s329_s2, [#allocation4]  }
  0xb9   :  { %263 = dma.done.wait [#allocation4], 128  }
  0xba   :  { %264 = vsyncadd [#allocation4], 4294967168 }
  0xbb   :  { %182 = vsyncpa [#allocation3], 1 }
  0xbc   :  { %183 = vsyncpa [#allocation6], 1 }
  0xbd   :  { %184 = vsyncpa [#allocation4], 1 }

</bundles_post_ra>
